<compile_context>
chip_gen: v7x
topology: tpu7x:2x2x1
jax: 0.10.0
libtpu: 0.0.40
codegen_flags: <defaults>
</compile_context>

<pallas_src>
import jax
import jax.numpy as jnp
from jax import lax
from jax.experimental import pallas as pl
from jax.experimental.pallas import tpu as pltpu


_VMEM_TILE_BUDGET_BYTES = 40 * 1024 * 1024   # working-set budget (v7x-safe: 64 MiB physical VMEM)
_VMEM_LIMIT_BYTES = 64 * 1024 * 1024         # raise scoped VMEM (v5e default is only 16 MiB)


# ---------------------------------------------------------------------------
# Fused Pallas kernel: one (batch-block, seq-block) grid step
# ---------------------------------------------------------------------------

def _gate_attention_kernel(x_ref, w_ref, o_ref, m_ref, l_ref, acc_ref):
    """Fused GateAttention with online softmax over the sequence axis.

    x_ref  : (TB, TS, H) input tile for this (batch-block, seq-block)
    w_ref  : (G, H)      gate weight (PyTorch nn.Linear layout), VMEM-resident
    o_ref  : (TB, G, H)  output tile (block index constant across the S axis)
    m_ref  : (TB, G, 1)  running row max                (f32 scratch)
    l_ref  : (TB, G, 1)  running softmax denominator    (f32 scratch)
    acc_ref: (TB, G, H)  running un-normalized output   (f32 scratch)
    """
    s_idx = pl.program_id(1)

    @pl.when(s_idx == 0)
    def _init():
        m_ref[...] = jnp.full_like(m_ref, -jnp.inf)
        l_ref[...] = jnp.zeros_like(l_ref)
        acc_ref[...] = jnp.zeros_like(acc_ref)

    x = x_ref[...]                                                    # (TB, TS, H)
    tb = x.shape[0]
    # Broadcast weight across the batch block (tiny copy) so both matmuls use the
    # standard flash-attention batched contraction patterns.
    w_b = jnp.broadcast_to(w_ref[...][None], (tb,) + tuple(w_ref.shape))  # (TB, G, H)

    # Gate logits for this sequence tile, directly in (TB, G, TS) layout:
    # contraction on the LAST axes of both operands -> no explicit x.T / XLU copy.
    s = jnp.einsum("bgh,bsh->bgs", w_b, x,
                   preferred_element_type=jnp.float32)                # (TB, G, TS)

    # Online-softmax update over the sequence (lane) axis.
    m_prev = m_ref[...]                                               # (TB, G, 1)
    m_new = jnp.maximum(m_prev, jnp.max(s, axis=-1, keepdims=True))   # (TB, G, 1)
    alpha = jnp.exp(m_prev - m_new)                                   # (TB, G, 1)
    p = jnp.exp(s - m_new)                                            # (TB, G, TS)
    l_ref[...] = alpha * l_ref[...] + jnp.sum(p, axis=-1, keepdims=True)
    acc_ref[...] = alpha * acc_ref[...] + jnp.einsum(
        "bgs,bsh->bgh", p.astype(x.dtype), x,
        preferred_element_type=jnp.float32)                           # (TB, G, H)
    m_ref[...] = m_new

    @pl.when(s_idx == pl.num_programs(1) - 1)
    def _finalize():
        # Normalization folded into the (G, H) output instead of the (G, S) attn
        # matrix. approx=True would push the divide to the EUP, but exact reciprocal
        # is kept so the 1e-4 comparison against the HIGHEST-precision reference holds.
        inv_l = pl.reciprocal(l_ref[...], approx=False)               # (TB, G, 1)
        o_ref[...] = (acc_ref[...] * inv_l).astype(o_ref.dtype)


# ---------------------------------------------------------------------------
# Tile selection (generation-aware VMEM budgeting)
# ---------------------------------------------------------------------------

def _divisors_desc(n):
    return [d for d in range(n, 0, -1) if n % d == 0]


def _pick_tiles(B, S, H, G, itemsize, budget_bytes=_VMEM_TILE_BUDGET_BYTES):
    """Pick (TB, TS): the largest batch block (biggest DMAs) that fits the VMEM
    budget; only tile S (online-softmax path) when even TB=1 would not fit."""

    def working_set(tb, ts):
        x_tiles = 2 * tb * ts * H * itemsize        # double-buffered input tiles
        out_tiles = 2 * tb * G * H * itemsize       # double-buffered output tiles
        w_tile = G * H * itemsize                   # resident gate weight
        w_bcast = tb * G * H * 4                    # broadcast weight temporary
        acc = tb * G * H * 4                        # f32 accumulator scratch
        stats = 2 * tb * G * 128 * 4                # m / l scratch (lane-padded)
        logits = 2 * tb * G * max(ts, 128) * 4      # logits / exp temporaries
        return x_tiles + out_tiles + w_tile + w_bcast + acc + stats + logits

    # Keep >= 2 batch blocks when possible so the parallel axis feeds both v7x cores.
    tb_cap = B if B == 1 else B // 2
    tb_cands = [d for d in _divisors_desc(B) if d <= tb_cap] or [1]
    # S tile must be a multiple of 8 (sublane) unless it is the full sequence.
    ts_cands = [S] + [d for d in _divisors_desc(S) if d != S and d % 8 == 0]
    for ts in ts_cands:
        for tb in tb_cands:
            if working_set(tb, ts) <= budget_bytes:
                return tb, ts
    return 1, ts_cands[-1]


# ---------------------------------------------------------------------------
# Wrapper (single pallas_call for the whole module forward)
# ---------------------------------------------------------------------------

def gate_attention_forward(params, x, *, block_b=None, block_s=None):
    """x: (B, S, H) float32 -> (B, G, H) float32 (matches GateAttention.forward)."""
    w = params["w"]                        # (G, H), PyTorch nn.Linear layout
    B, S, H = x.shape
    G, Hw = w.shape
    assert H == Hw, (H, Hw)
    # H sits on the lane axis; multiples of 128 give unmasked lane-dense stores.

    tb, ts = _pick_tiles(B, S, H, G, x.dtype.itemsize)
    if block_b is not None:
        tb = block_b
    if block_s is not None:
        ts = block_s
    assert B % tb == 0 and S % ts == 0, (B, tb, S, ts)
    assert ts == S or ts % 8 == 0, ts      # sublane constraint on the seq tile

    grid = (B // tb, S // ts)              # batch (parallel) first, seq (arbitrary) last

    return pl.pallas_call(
        _gate_attention_kernel,
        out_shape=jax.ShapeDtypeStruct((B, G, H), x.dtype),
        grid_spec=pltpu.PrefetchScalarGridSpec(
            num_scalar_prefetch=0,
            grid=grid,
            in_specs=[
                pl.BlockSpec((tb, ts, H), lambda b, s: (b, s, 0)),
                # Constant block index -> gate weight stays resident in VMEM.
                pl.BlockSpec((G, H), lambda b, s: (0, 0)),
            ],
            out_specs=pl.BlockSpec((tb, G, H), lambda b, s: (b, 0, 0)),
            scratch_shapes=[
                pltpu.VMEM((tb, G, 1), jnp.float32),   # running max
                pltpu.VMEM((tb, G, 1), jnp.float32),   # running denominator
                pltpu.VMEM((tb, G, H), jnp.float32),   # un-normalized output
            ],
        ),
        compiler_params=pltpu.CompilerParams(
            dimension_semantics=("parallel", "arbitrary"),
            vmem_limit_bytes=_VMEM_LIMIT_BYTES,
        ),
    )(x, w)


# ---------------------------------------------------------------------------
# Parameter init (matches nn.init.xavier_uniform_ on a bias-free Linear)
# ---------------------------------------------------------------------------

def init_gate_attention_params(key, hidden_size, n_gates):
    bound = jnp.sqrt(6.0 / (hidden_size + n_gates))        # xavier_uniform
    w = jax.random.uniform(key, (n_gates, hidden_size), jnp.float32, -bound, bound)
    return {"w": w}


# ---------------------------------------------------------------------------
# Plain-JAX reference for correctness checking
# ---------------------------------------------------------------------------

def gate_attention_reference(params, x):
    w = params["w"]                                                      # (G, H)
    logits = jnp.einsum("bsh,gh->bsg", x, w,
                        precision=lax.Precision.HIGHEST)                 # (B, S, G)
    attn = jax.nn.softmax(jnp.swapaxes(logits, 1, 2), axis=-1)           # (B, G, S)
    return jnp.einsum("bgs,bsh->bgh", attn, x,
                      precision=lax.Precision.HIGHEST)                   # (B, G, H)


if __name__ == "__main__":
    key = jax.random.PRNGKey(0)
    kx, kw = jax.random.split(key)

    batch, seq, hidden, n_gates = 8, 16, 128, 8

    x = jax.random.normal(kx, (batch, seq, hidden), jnp.float32)
    params = init_gate_attention_params(kw, hidden, n_gates)

    ref = gate_attention_reference(params, x)

    # Auto-tiled path (single pass over S at this size, TB=4 -> 2 parallel steps).
    out = gate_attention_forward(params, x)
    jax.block_until_ready(out)
    assert out.shape == (batch, n_gates, hidden), out.shape
    assert jnp.allclose(out, ref, atol=1e-4, rtol=1e-4), \
        float(jnp.max(jnp.abs(out - ref)))

    # Forced small tiles: exercises the S-tiled online-softmax (flash-style) path.
    out_tiled = gate_attention_forward(params, x, block_b=2, block_s=8)
    jax.block_until_ready(out_tiled)
    assert jnp.allclose(out_tiled, ref, atol=1e-4, rtol=1e-4), \
        float(jnp.max(jnp.abs(out_tiled - ref)))

    print("KERNEL_OK")
</pallas_src>

<mosaic_0001>
module attributes {stable_mosaic.version = 11 : i64} {
  func.func @_gate_attention_kernel(%arg0: i32, %arg1: i32, %arg2: memref<4x16x128xf32, #tpu.memory_space<vmem>>, %arg3: memref<8x128xf32, #tpu.memory_space<vmem>>, %arg4: memref<4x8x128xf32, #tpu.memory_space<vmem>>, %arg5: memref<4x8x1xf32, #tpu.memory_space<vmem>>, %arg6: memref<4x8x1xf32, #tpu.memory_space<vmem>>, %arg7: memref<4x8x128xf32, #tpu.memory_space<vmem>>) attributes {dimension_semantics = [#tpu.dimension_semantics<parallel>, #tpu.dimension_semantics<arbitrary>], iteration_bounds = array<i64: 2, 1>, scalar_prefetch = 0 : i64, scratch_operands = 3 : i64, tpu.core_type = #tpu.core_type<tc>, window_params = [{transform_indices = @transform_0, window_bounds = array<i64: 4, 16, 128>}, {pipeline_mode = #tpu.pipeline_mode<synchronous>, transform_indices = @transform_1, window_bounds = array<i64: 8, 128>}, {transform_indices = @transform_2, window_bounds = array<i64: 4, 8, 128>}]} {
    %c0_i32 = arith.constant 0 : i32
    %0 = arith.cmpi eq, %arg1, %c0_i32 : i32
    %1 = arith.extui %0 : i1 to i32
    %c0_i32_0 = arith.constant 0 : i32
    %2 = arith.cmpi ne, %1, %c0_i32_0 : i32
    scf.if %2 {
      %cst_28 = arith.constant 0xFF800000 : f32
      %34 = vector.broadcast %cst_28 : f32 to vector<4x8x1xf32>
      %c0_29 = arith.constant 0 : index
      %c0_30 = arith.constant 0 : index
      %c0_31 = arith.constant 0 : index
      %35 = vector.load %arg5[%c0_29, %c0_30, %c0_31] : memref<4x8x1xf32, #tpu.memory_space<vmem>>, vector<4x8x1xf32>
      tpu.vector_store %arg5[%c0_29, %c0_30, %c0_31], %34 {strides = array<i32>} : memref<4x8x1xf32, #tpu.memory_space<vmem>>, vector<4x8x1xf32>,
      %cst_32 = arith.constant 0.000000e+00 : f32
      %36 = vector.broadcast %cst_32 : f32 to vector<4x8x1xf32>
      %c0_33 = arith.constant 0 : index
      %c0_34 = arith.constant 0 : index
      %c0_35 = arith.constant 0 : index
      %37 = vector.load %arg6[%c0_33, %c0_34, %c0_35] : memref<4x8x1xf32, #tpu.memory_space<vmem>>, vector<4x8x1xf32>
      tpu.vector_store %arg6[%c0_33, %c0_34, %c0_35], %36 {strides = array<i32>} : memref<4x8x1xf32, #tpu.memory_space<vmem>>, vector<4x8x1xf32>,
      %cst_36 = arith.constant 0.000000e+00 : f32
      %38 = vector.broadcast %cst_36 : f32 to vector<4x8x128xf32>
      %c0_37 = arith.constant 0 : index
      %c0_38 = arith.constant 0 : index
      %c0_39 = arith.constant 0 : index
      %39 = vector.load %arg7[%c0_37, %c0_38, %c0_39] : memref<4x8x128xf32, #tpu.memory_space<vmem>>, vector<4x8x128xf32>
      tpu.vector_store %arg7[%c0_37, %c0_38, %c0_39], %38 {strides = array<i32>} : memref<4x8x128xf32, #tpu.memory_space<vmem>>, vector<4x8x128xf32>,
    } else {
    }
    %c0 = arith.constant 0 : index
    %c0_1 = arith.constant 0 : index
    %c0_2 = arith.constant 0 : index
    %3 = vector.load %arg2[%c0, %c0_1, %c0_2] : memref<4x16x128xf32, #tpu.memory_space<vmem>>, vector<4x16x128xf32>
    %c0_3 = arith.constant 0 : index
    %c0_4 = arith.constant 0 : index
    %4 = vector.load %arg3[%c0_3, %c0_4] : memref<8x128xf32, #tpu.memory_space<vmem>>, vector<8x128xf32>
    %5 = vector.shape_cast %4 : vector<8x128xf32> to vector<1x8x128xf32>
    %6 = vector.shape_cast %5 : vector<1x8x128xf32> to vector<1x8x128xf32>
    %7 = vector.broadcast %6 : vector<1x8x128xf32> to vector<4x8x128xf32>
    "tpu.trace_start"() <{level = 10 : i32, message = "bgh,bsh->bgs"}> : () -> ()
    %cst = arith.constant dense<0.000000e+00> : vector<4x8x16xf32>
    %8 = tpu.matmul %7, %3, %cst {dimension_numbers = #tpu.dot_dimension_numbers<[2], [2], [1], [1], [0, 0, 0, 1, 1, 1], [0], [0]>} : vector<4x8x128xf32>, vector<4x16x128xf32>, vector<4x8x16xf32> -> vector<4x8x16xf32>
    "tpu.trace_stop"() : () -> ()
    %c0_5 = arith.constant 0 : index
    %c0_6 = arith.constant 0 : index
    %c0_7 = arith.constant 0 : index
    %9 = vector.load %arg5[%c0_5, %c0_6, %c0_7] : memref<4x8x1xf32, #tpu.memory_space<vmem>>, vector<4x8x1xf32>
    %cst_8 = arith.constant dense<0xFF800000> : vector<4x8xf32>
    %10 = vector.multi_reduction <maximumf>, %8, %cst_8 [2] : vector<4x8x16xf32> to vector<4x8xf32>
    %11 = vector.shape_cast %10 : vector<4x8xf32> to vector<4x8x1xf32>
    %12 = arith.maximumf %9, %11 : vector<4x8x1xf32>
    %13 = arith.subf %9, %12 : vector<4x8x1xf32>
    %14 = math.exp %13 : vector<4x8x1xf32>
    %15 = vector.broadcast %12 : vector<4x8x1xf32> to vector<4x8x16xf32>
    %16 = arith.subf %8, %15 : vector<4x8x16xf32>
    %17 = math.exp %16 : vector<4x8x16xf32>
    %c0_9 = arith.constant 0 : index
    %c0_10 = arith.constant 0 : index
    %c0_11 = arith.constant 0 : index
    %18 = vector.load %arg6[%c0_9, %c0_10, %c0_11] : memref<4x8x1xf32, #tpu.memory_space<vmem>>, vector<4x8x1xf32>
    %19 = arith.mulf %14, %18 : vector<4x8x1xf32>
    %cst_12 = arith.constant dense<0.000000e+00> : vector<4x8xf32>
    %20 = vector.multi_reduction <add>, %17, %cst_12 [2] : vector<4x8x16xf32> to vector<4x8xf32>
    %21 = vector.shape_cast %20 : vector<4x8xf32> to vector<4x8x1xf32>
    %22 = arith.addf %19, %21 : vector<4x8x1xf32>
    %c0_13 = arith.constant 0 : index
    %c0_14 = arith.constant 0 : index
    %c0_15 = arith.constant 0 : index
    %23 = vector.load %arg6[%c0_13, %c0_14, %c0_15] : memref<4x8x1xf32, #tpu.memory_space<vmem>>, vector<4x8x1xf32>
    tpu.vector_store %arg6[%c0_13, %c0_14, %c0_15], %22 {strides = array<i32>} : memref<4x8x1xf32, #tpu.memory_space<vmem>>, vector<4x8x1xf32>,
    %c0_16 = arith.constant 0 : index
    %c0_17 = arith.constant 0 : index
    %c0_18 = arith.constant 0 : index
    %24 = vector.load %arg7[%c0_16, %c0_17, %c0_18] : memref<4x8x128xf32, #tpu.memory_space<vmem>>, vector<4x8x128xf32>
    %25 = vector.broadcast %14 : vector<4x8x1xf32> to vector<4x8x128xf32>
    %26 = arith.mulf %25, %24 : vector<4x8x128xf32>
    "tpu.trace_start"() <{level = 10 : i32, message = "bgs,bsh->bgh"}> : () -> ()
    %cst_19 = arith.constant dense<0.000000e+00> : vector<4x8x128xf32>
    %27 = tpu.matmul %17, %3, %cst_19 {dimension_numbers = #tpu.dot_dimension_numbers<[2], [1], [1], [2], [0, 0, 0, 1, 1, 2], [0], [0]>} : vector<4x8x16xf32>, vector<4x16x128xf32>, vector<4x8x128xf32> -> vector<4x8x128xf32>
    "tpu.trace_stop"() : () -> ()
    %28 = arith.addf %26, %27 : vector<4x8x128xf32>
    %c0_20 = arith.constant 0 : index
    %c0_21 = arith.constant 0 : index
    %c0_22 = arith.constant 0 : index
    %29 = vector.load %arg7[%c0_20, %c0_21, %c0_22] : memref<4x8x128xf32, #tpu.memory_space<vmem>>, vector<4x8x128xf32>
    tpu.vector_store %arg7[%c0_20, %c0_21, %c0_22], %28 {strides = array<i32>} : memref<4x8x128xf32, #tpu.memory_space<vmem>>, vector<4x8x128xf32>,
    %c0_23 = arith.constant 0 : index
    %c0_24 = arith.constant 0 : index
    %c0_25 = arith.constant 0 : index
    %30 = vector.load %arg5[%c0_23, %c0_24, %c0_25] : memref<4x8x1xf32, #tpu.memory_space<vmem>>, vector<4x8x1xf32>
    tpu.vector_store %arg5[%c0_23, %c0_24, %c0_25], %12 {strides = array<i32>} : memref<4x8x1xf32, #tpu.memory_space<vmem>>, vector<4x8x1xf32>,
    %c0_i32_26 = arith.constant 0 : i32
    %31 = arith.cmpi eq, %arg1, %c0_i32_26 : i32
    %32 = arith.extui %31 : i1 to i32
    %c0_i32_27 = arith.constant 0 : i32
    %33 = arith.cmpi ne, %32, %c0_i32_27 : i32
    scf.if %33 {
      %c0_28 = arith.constant 0 : index
      %c0_29 = arith.constant 0 : index
      %c0_30 = arith.constant 0 : index
      %34 = vector.load %arg6[%c0_28, %c0_29, %c0_30] : memref<4x8x1xf32, #tpu.memory_space<vmem>>, vector<4x8x1xf32>
      %35 = tpu.reciprocal %34 : vector<4x8x1xf32> -> vector<4x8x1xf32>
      %c0_31 = arith.constant 0 : index
      %c0_32 = arith.constant 0 : index
      %c0_33 = arith.constant 0 : index
      %36 = vector.load %arg7[%c0_31, %c0_32, %c0_33] : memref<4x8x128xf32, #tpu.memory_space<vmem>>, vector<4x8x128xf32>
      %37 = vector.broadcast %35 : vector<4x8x1xf32> to vector<4x8x128xf32>
      %38 = arith.mulf %36, %37 : vector<4x8x128xf32>
      %c0_34 = arith.constant 0 : index
      %c0_35 = arith.constant 0 : index
      %c0_36 = arith.constant 0 : index
      %39 = vector.load %arg4[%c0_34, %c0_35, %c0_36] : memref<4x8x128xf32, #tpu.memory_space<vmem>>, vector<4x8x128xf32>
      tpu.vector_store %arg4[%c0_34, %c0_35, %c0_36], %38 {strides = array<i32>} : memref<4x8x128xf32, #tpu.memory_space<vmem>>, vector<4x8x128xf32>,
    } else {
    }
    return
  }
  func.func @transform_0(%arg0: i32, %arg1: i32) -> (i32, i32, i32) {
    %c0_i32 = arith.constant 0 : i32
    %c0_i32_0 = arith.constant 0 : i32
    return %arg0, %arg1, %c0_i32 : i32, i32, i32
  }
  func.func @transform_1(%arg0: i32, %arg1: i32) -> (i32, i32) {
    %c0_i32 = arith.constant 0 : i32
    %c0_i32_0 = arith.constant 0 : i32
    %c0_i32_1 = arith.constant 0 : i32
    return %c0_i32, %c0_i32_0 : i32, i32
  }
  func.func @transform_2(%arg0: i32, %arg1: i32) -> (i32, i32, i32) {
    %c0_i32 = arith.constant 0 : i32
    %c0_i32_0 = arith.constant 0 : i32
    %c0_i32_1 = arith.constant 0 : i32
    return %arg0, %c0_i32, %c0_i32_0 : i32, i32, i32
  }
}

</mosaic_0001>

<bundles_post_ra>
// kernel: tpu_custom_call.1
= control target key start
LH: loop header
LB: loop body
LE: loop exit
PB: predicated region body
PF: predicated region fallthrough
CT: control target
= control target key end

     0   :  { %7 = vsyncpa [#allocation6], 0  ;;  %s1766_s0 = inlined_call_operand.hbm [shape: f32[8,16,128], index: 0, kind: input, shape index: {}]   ;;  %s1767_s1 = inlined_call_operand.hbm [shape: f32[8,128], index: 1, kind: input, shape index: {}]   ;;  %s1768_s2 = inlined_call_operand.hbm [shape: f32[8,8,128], index: 2, kind: output, shape index: {}]  }
   0x1   :  { %9 = vsyncpa [#allocation6 + $0x1], 0 }
   0x2   :  { %10 = vsyncpa [#allocation9], 0 }
   0x3   :  { %11 = vsyncpa [#allocation7], 0 }
   0x4   :  { %13 = vsyncpa [#allocation7 + $0x1], 0  ;;  %s1488_s9 = smov 0   ;;  %s1490_s10 = smov 0  }
   0x5   :  { %s1492_s11 = smov 0   ;;  %s1494_s12 = smov 0  }
   0x6   :  { %s1496_s13 = smov 0   ;;  %s1498_s14 = smov 0  }
   0x7 LB: > { %s1078_s15 = sadd.s32 4294967295, %s1459_s14   ;;  %s1079_s16 = sadd.s32 4294967294, %s1459_s14   ;;  %s1459_s14 = sphi %s1498_s14, %s19_s14   ;;  %s1455_s13 = sphi %s1496_s13, %s1796_s13   ;;  %s1451_s12 = sphi %s1494_s12, %s1795_s12   ;;  %s1447_s11 = sphi %s1492_s11, %s1794_s11   ;;  %s1443_s10 = sphi %s1490_s10, %s1793_s10   ;;  %s1439_s9 = sphi %s1488_s9, %s1792_s9  }
   0x8   : > { %s40_s17 = sadd.s32 1, %s1447_s11  ;;  %p47_p0 = scmp.ne.s32.totalorder %s1447_s11, %s1443_s10 }
   0x9   : > { %p48_p1 = scmp.eq.s32.totalorder %s1459_s14, 0  ;;  %p53_p2 = scmp.ne.s32.totalorder %s1443_s10, %s1439_s9 }
   0xa   : > { %p1526_p3 = scmp.eq.s32.totalorder %s1078_s15, 0  ;;  %p98_p4 = scmp.eq.s32.totalorder %s1078_s15, 1 }
   0xb   : > { %p1530_p5 = por %p48_p1, %p47_p0  ;;  %p104_p6 = scmp.eq.s32.totalorder %s1079_s16, 1 }
   0xc   : > { %s1775_s18 = scalar_select %p1526_p3, 1, 0 }
   0xd   : > { %p1536_p7 = por %p1526_p3, %p53_p2  ;;  %p1540_p8 = por %p98_p4, %p47_p0 }
   0xe   : > { %p1544_p9 = por %p104_p6, %p53_p2  ;;  %p1080_p10 = scmp.ge.s32.totalorder %s1459_s14, 1 }
   0xf   : > { %s1777_s20 = scalar_select %p1536_p7, 1, 0 }
  0x10   : > { %s1778_s21 = scalar_select %p1540_p8, 1, 0 }
  0x11   : > { %s1779_s22 = scalar_select %p1544_p9, 1, 0 }
  0x12   : > { %p111_p11 = scmp.lt.s32.totalorder %s1459_s14, 3  ;;  %s1461_s24 = smov [#allocation8]  }
  0x13   : > { %s124_s25 = sshll.u32 %s1461_s24, 4  ;;  %p1228_p1 = scmp.lt.s32.totalorder %s1459_s14, 2  ;;  %s125_s25 = int_to_ptr.vmem [resolvable:$true] %s124_s25 }
  0x14   : > { %p1551_p13 = pnand %p1080_p10, %p111_p11  ;;  %s31_s28 = sadd.s32 1, %s1455_s13 }
  0x15   : > { %p1560_p4 = pnand %p1228_p1, %p1530_p5  ;;  %p1571_p6 = scmp.ge.s32.totalorder %s31_s28, 2 }
  0x16   : > { %s1780_s23 = scalar_select %p1551_p13, 1, 0 }
  0x17   : > { %p1215_p0 = pneg %p1551_p13  ;;  %s135_s30 = sand.u32 1, %s1447_s11  }
  0x18   : > { %s1781_s26 = scalar_select %p1560_p4, 1, 0 }
  0x19   : > { %p1566_p2 = pnand %p1215_p0, %p1526_p3  ;;  %s1315_s5 = scalar_lea.hbm %s1767_s1, 128 }
  0x1a   : > { %s1783_s29 = scalar_select %p1571_p6, 1, 0 }
  0x1b   : > { %p1316_p5 = scmp.ne.s32.totalorder %s1767_s1, %s1315_s5  ;;  %p1317_p10 = pneg %p1566_p2 }
  0x1c   : > { %p1322_p0 = scmp.lt.u32.totalorder %s1315_s5, %s1767_s1 }
  0x1d   : > { %p1318_p11 = pnand %p1317_p10, %p1316_p5 }
  0x1f   : > { %p1319_p1 = pneg %p1318_p11 }
  0x21   : > { %p1324_p12 = pnand %p1322_p0, %p1319_p1 }
  0x23   : > { %1327 = shalt.err (!%p1324_p12)
}
  0x24   : > { %s1328_s16 = scalar_lea.vmem %s125_s25, 128  ;;  %p1336_p7 = scmp.lt.s32.totalorder %s125_s25, %s125_s25 }
  0x25   : > { %p1329_p9 = scmp.ne.s32.totalorder %s125_s25, %s1328_s16  ;;  %p1337_p13 = scmp.lt.s32.totalorder %s1328_s16, %s1328_s16 }
  0x27   : > { %p1331_p8 = pnand %p1329_p9, %p1317_p10  ;;  %p1338_p4 = por %p1337_p13, %p1336_p7 }
  0x29   : > { %p1332_p3 = pneg %p1331_p8 }
  0x2b   : > { %p1339_p6 = pnand %p1338_p4, %p1332_p3 }
  0x2d   : > { %1342 = shalt.err (!%p1339_p6)
}
  0x2e   : > { %1218 = dma.hbm_to_vmem [thread:$0]  (!%p1566_p2), %s1767_s1, 128, %s125_s25, [#allocation9]  }
  0x2f   : > { %p1784_p9 = scmp.ne.s32.totalorder %s1783_s29, 0  ;;  %s1083_s3 = sshll.u32 %s135_s30, 6 }
  0x30   : > { %s1101_s5 = sshll.u32 %s1455_s13, 10  ;;  %s139_s8 = scalar_lea.vmem [#allocation5], %s1083_s3 }
  0x31   : > { %s1798_s28 = smov (%p1784_p9, %s31_s28), 0  ;;  %s1602_s7 = scalar_lea.hbm %s1766_s0, %s1101_s5 }
  0x32   : > { %s35_s4 = ssub.s32 %s1455_s13, %s1798_s28  ;;  %s149_s15 = sshll.u32 %s139_s8, 4  ;;  %s1609_s15 = int_to_ptr.vmem [resolvable:$true] %s149_s15 }
  0x33   : > { %p38_p3 = scmp.eq.s32.totalorder %s35_s4, 0  ;;  %s1611_s29 = scalar_lea.sflag [#allocation6], %s135_s30 }
  0x34   : > { %s1343_s16 = scalar_lea.hbm %s1602_s7, 1024  ;;  %p1785_p8 = scmp.ne.s32.totalorder %s1781_s26, 0 }
  0x35   : > { %s1607_s25 = scalar_select %p38_p3, %s1447_s11, %s40_s17  }
  0x36   : > { %p1344_p7 = scmp.ne.s32.totalorder %s1602_s7, %s1343_s16  ;;  %p1345_p12 = pneg %p1785_p8 }
  0x37   : > { %s1348_s3 = scalar_lea.hbm %s1766_s0, 2048  ;;  %p1349_p2 = scmp.lt.u32.totalorder %s1602_s7, %s1766_s0 }
  0x38   : > { %p1346_p13 = pnand %p1345_p12, %p1344_p7  ;;  %p1350_p6 = scmp.lt.u32.totalorder %s1348_s3, %s1343_s16 }
  0x39   : > { %p1352_p10 = scmp.lt.u32.totalorder %s1343_s16, %s1602_s7 }
  0x3a   : > { %p1347_p4 = pneg %p1346_p13  ;;  %p1351_p5 = por %p1350_p6, %p1349_p2 }
  0x3c   : > { %p1353_p11 = por %p1352_p10, %p1351_p5 }
  0x3e   : > { %p1354_p1 = pnand %p1353_p11, %p1347_p4 }
  0x40   : > { %1357 = shalt.err (!%p1354_p1)
}
  0x41   : > { %s1358_s17 = scalar_lea.vmem %s1609_s15, 1024  ;;  %s1462_s30 = smov [#allocation5]  }
  0x42   : > { %p1359_p0 = scmp.ne.s32.totalorder %s1609_s15, %s1358_s17  ;;  %s1363_s27 = sshll.u32 %s1462_s30, 4  ;;  %s1364_s27 = int_to_ptr.vmem [resolvable:$false] %s1363_s27 }
  0x43   : > { %s1365_s6 = scalar_lea.vmem %s1364_s27, 2048  ;;  %p1366_p7 = scmp.lt.s32.totalorder %s1609_s15, %s1364_s27 }
  0x44   : > { %p1361_p9 = pnand %p1359_p0, %p1345_p12  ;;  %p1367_p13 = scmp.lt.s32.totalorder %s1365_s6, %s1358_s17 }
  0x46   : > { %p1362_p3 = pneg %p1361_p9  ;;  %p1368_p2 = por %p1367_p13, %p1366_p7 }
  0x48   : > { %p1369_p6 = pnand %p1368_p2, %p1362_p3 }
  0x4a   : > { %1372 = shalt.err (!%p1369_p6)
}
  0x4b   : > { %s1463_s8 = smov 128   ;;  %s1464_s16 = smov 8  }
  0x4c   : > { %1222 = dma.hbm_to_vmem [thread:$0]  (!%p1785_p8), %s1602_s7, 1024, %s1609_s15, %s1611_s29, %s1463_s8, %s1463_s8, %s1464_s16  }
  0x4d   : > { %p1786_p12 = scmp.ne.s32.totalorder %s1780_s23, 0 }
  0x4e   : > { %s1642_s19 = sand.u32 (!%p1786_p12), 1, %s1443_s10   ;;  %p1787_p4 = scmp.ne.s32.totalorder (!%p1786_p12), %s1777_s20, 0 }
  0x4f   : > { %161 = sbr.rel (%p1786_p12) target bundleno = 922 (0x39a), region = 28  ;;  %s1088_s24 = sshll.u32 (!%p1786_p12), %s1642_s19, 6 }
  0x50   : > { %s164_s3 = scalar_lea.sflag (!%p1786_p12), [#allocation6], %s1642_s19  ;;  %s167_s4 = scalar_lea.vmem (!%p1786_p12), [#allocation5], %s1088_s24 }
  0x56   : > { %1426 = dma.done.wait (%p1787_p4), %s164_s3, 1024  }
  0x57   : > { %1428 = vsyncadd (%p1787_p4), %s164_s3, 4294966272  ;;  %p1788_p5 = scmp.ne.s32.totalorder %s1775_s18, 0 }
  0x59   : > { %1430 = dma.done.wait (%p1788_p5), [#allocation9], 128  }
  0x5a   : > { %1432 = vsyncadd (%p1788_p5), [#allocation9], 4294967168  ;;  %v1465_v0 = vmov 0.0|0.0   ;;  %vm1466_vm0 = vmmov 0   ;;  %v1467_v1 = vmov 0.0   ;;  %v212_v2 = vld [vmem:[%s167_s4] sm:$0xff] }
  0x5b   : > { %1183 = vmatprep.subr.bf16.mxu0 %v1465_v0  ;;  %1186 = vmatprep.subr.bf16.mxu1 %v1465_v0  ;;  %v213_v3 = vld [vmem:[%s167_s4 + $0x8] sm:$0xff]  ;;  %v214_v4 = vld [vmem:[%s167_s4 + $0x10] sm:$0xff]  ;;  %v215_v6 = vld [vmem:[%s167_s4 + $0x18] sm:$0xff]  ;;  %vm199_vm1 = vcmask 7168   ;;  %v1468_v15 = vmov -inf   ;;  %vm505_vm2 = vcmask 130048  }
  0x5c   : > { %1131 = vmatprep.mubr.msk.f32.mxu0 %vm1466_vm0, %v1467_v1  ;;  %1138 = vmatprep.mubr.msk.f32.mxu1 %vm1466_vm0, %v1467_v1  ;;  %v1184_v5 = vpack.c.bf16 %v213_v3, %v212_v2  ;;  %v1187_v7 = vpack.c.bf16 %v215_v6, %v214_v4  ;;  %v216_v8 = vld [vmem:[%s167_s4 + $0x20] sm:$0xff]  ;;  %v217_v9 = vld [vmem:[%s167_s4 + $0x28] sm:$0xff]  ;;  %v218_v10 = vld [vmem:[%s167_s4 + $0x30] sm:$0xff]  ;;  %200 = vst.msk [vmem:[#allocation2] sm:$0xff] %vm199_vm1, %v1468_v15  ;;  %v1469_v28 = vmov 0   ;;  %s1090_s18 = sshll.u32 %s1642_s19, 5 }
  0x5d   : > { %v219_v11 = vld [vmem:[%s167_s4 + $0x38] sm:$0xff]  ;;  %v220_v12 = vld [vmem:[#allocation8] sm:$0xff]  ;;  %v1658_v13 = vpack.c.bf16 %v217_v9, %v216_v8  ;;  %201 = vst.msk [vmem:[#allocation2 + $0x8] sm:$0xff] %vm199_vm1, %v1468_v15  ;;  %202 = vst.msk [vmem:[#allocation2 + $0x10] sm:$0xff] %vm199_vm1, %v1468_v15  ;;  %1289 = vset.pattern.permute.xlu0 %v1469_v28  ;;  %1290 = vset.pattern.permute.xlu1 %v1469_v28  ;;  %s191_s20 = scalar_lea.vmem [#allocation10], %s1090_s18  ;;  %s1102_s26 = sshll.u32 %s1451_s12, 9 }
  0x5e   : > { %1185 = vmatpush3.bf16.xpose.msra.mxu0 %v1184_v5  ;;  %1188 = vmatpush3.bf16.xpose.msra.mxu1 %v1187_v7  ;;  %v1660_v14 = vpack.c.bf16 %v219_v11, %v218_v10  ;;  %203 = vst.msk [vmem:[#allocation2 + $0x18] sm:$0xff] %vm199_vm1, %v1468_v15  ;;  %204 = vst.msk [vmem:[#allocation3] sm:$0xff] %vm199_vm1, %v1467_v1  ;;  %s984_s23 = sshll.u32 %s191_s20, 4  ;;  %s1717_s29 = scalar_lea.hbm %s1768_s2, %s1102_s26  ;;  %s1712_s23 = int_to_ptr.vmem [resolvable:$true] %s984_s23 }
  0x5f   : > { %1189 = vmatprep.subr.bf16.mxu0 %v1465_v0  ;;  %1192 = vmatprep.subr.bf16.mxu1 %v1465_v0  ;;  %205 = vst.msk [vmem:[#allocation3 + $0x8] sm:$0xff] %vm199_vm1, %v1467_v1  ;;  %206 = vst.msk [vmem:[#allocation3 + $0x10] sm:$0xff] %vm199_vm1, %v1467_v1  ;;  %s971_s5 = scalar_lea.sflag [#allocation7], %s1642_s19  ;;  %s1373_s17 = scalar_lea.vmem %s1712_s23, 512 }
  0x60   : > { %207 = vst.msk [vmem:[#allocation3 + $0x18] sm:$0xff] %vm199_vm1, %v1467_v1  ;;  %p1374_p8 = scmp.ne.s32.totalorder %s1712_s23, %s1373_s17  ;;  %p1789_p10 = scmp.ne.s32.totalorder %s1778_s21, 0 }
  0x61   : > { %s1470_s12 = smov [#allocation10]  }
  0x62   : > { %p1375_p11 = pnand %p1374_p8, %p1789_p10  ;;  %s1377_s30 = sshll.u32 %s1470_s12, 4  ;;  %s1378_s30 = int_to_ptr.vmem [resolvable:$false] %s1377_s30 }
  0x63   : > { %v501_v29 = vld [vmem:[#allocation2] sm:$0xff]  ;;  %s1379_s27 = scalar_lea.vmem %s1378_s30, 1024  ;;  %p1380_p0 = scmp.lt.s32.totalorder %s1712_s23, %s1378_s30 }
  0x64   : > { %v502_v32 = vld [vmem:[#allocation2 + $0x8] sm:$0xff]  ;;  %v503_v36 = vld [vmem:[#allocation2 + $0x10] sm:$0xff]  ;;  %p1376_p1 = pneg %p1375_p11  ;;  %p1381_p9 = scmp.lt.s32.totalorder %s1379_s27, %s1373_s17 }
  0x65   : > { %1132 = vmatmul.mubr.f32.vlgmr.msra.gmra.mrb[0].mxu0 %v220_v12  ;;  %1139 = vmatmul.mubr.f32.vlgmr.msra.gmra.mrb[0].mxu1 %v220_v12  ;;  %v504_v40 = vld [vmem:[#allocation2 + $0x18] sm:$0xff]  ;;  %v566_v9 = vld [vmem:[#allocation3] sm:$0xff] }
  0x66   : > { %1191 = vmatpush3.bf16.xpose.msra.mxu0 %v1658_v13  ;;  %1194 = vmatpush3.bf16.xpose.msra.mxu1 %v1660_v14  ;;  %p1382_p3 = por %p1381_p9, %p1380_p0 }
  0x67   : > { %1145 = vmatprep.mubr.msk.f32.mxu0 %vm1466_vm0, %v1467_v1  ;;  %1152 = vmatprep.mubr.msk.f32.mxu1 %vm1466_vm0, %v1467_v1 }
  0x68   : > { %1195 = vmatprep.subr.bf16.mxu0 %v1465_v0  ;;  %1198 = vmatprep.subr.bf16.mxu1 %v1465_v0  ;;  %p1383_p7 = pnand %p1382_p3, %p1376_p1 }
  0x6d   : > { %1146 = vmatmul.mubr.f32.vlgmr.msra.gmra.mrb[2].mxu0 %v220_v12  ;;  %1153 = vmatmul.mubr.f32.vlgmr.msra.gmra.mrb[2].mxu1 %v220_v12  ;;  %v567_v12 = vld [vmem:[#allocation3 + $0x8] sm:$0xff] }
  0x6e   : > { %1197 = vmatpush3.bf16.msra.mxu0 %v1184_v5  ;;  %1159 = vmatprep.mubr.msk.f32.mxu0 %vm1466_vm0, %v1467_v1 }
  0x6f   : > { %1200 = vmatpush3.bf16.msra.mxu1 %v1187_v7  ;;  %1166 = vmatprep.mubr.msk.f32.mxu1 %vm1466_vm0, %v1467_v1 }
  0x70   : > { %1201 = vmatprep.subr.bf16.mxu0 %v1465_v0  ;;  %1204 = vmatprep.subr.bf16.mxu1 %v1465_v0 }
 0x138   : > { %v287_v16 = vpop.f32.mrb[0].mxu0  ;;  %v357_v19 = vpop.f32.mrb[0].mxu1 }
 0x139   : > { %v1133_v17 = vpop.f32.mrb[1].mxu0  ;;  %v506_v18 = vsel %vm505_vm2, %v287_v16, -inf  ;;  %v1140_v20 = vpop.f32.mrb[1].mxu1  ;;  %v509_v21 = vsel %vm505_vm2, %v357_v19, -inf }
 0x13a   : > { %507 = vmax.xlane.f32.xlu0 %v506_v18  ;;  %v569_v20 = vld [vmem:[#allocation3 + $0x18] sm:$0xff] }
 0x13e   : > { %510 = vmax.xlane.f32.xlu0 %v509_v21 }
 0x140   : > { %v427_v22 = vpop.f32.mrb[2].mxu0  ;;  %v497_v25 = vpop.f32.mrb[2].mxu1 }
 0x141   : > { %v1147_v23 = vpop.f32.mrb[3].mxu0  ;;  %v512_v24 = vsel %vm505_vm2, %v427_v22, -inf  ;;  %v1154_v26 = vpop.f32.mrb[3].mxu1  ;;  %v515_v27 = vsel %vm505_vm2, %v497_v25, -inf }
 0x142   : > { %513 = vmax.xlane.f32.xlu1 %v512_v24 }
 0x146   : > { %516 = vmax.xlane.f32.xlu1 %v515_v27 }
 0x1c7   : > { %v508_v30 = vpop.xlane.xlu0 %507 }
 0x1c8   : > { %v518_v31 = vmax.f32 %v501_v29, %v508_v30 }
 0x1ca   : > { %v522_v33 = vsub.f32 %v501_v29, %v518_v31  ;;  %923 = vst.msk [vmem:[#allocation2] sm:$0xff] %vm199_vm1, %v518_v31  ;;  %536 = vperm.xlu0 %1289, %v518_v31  }
 0x1cb   : > { %v511_v34 = vpop.xlane.xlu0 %510 }
 0x1cc   : > { %v519_v35 = vmax.f32 %v502_v32, %v511_v34  ;;  %v526_v3 = vmul.f32 1.442695, %v522_v33 }
 0x1ce   : > { %v523_v37 = vsub.f32 %v502_v32, %v519_v35  ;;  %924 = vst.msk [vmem:[#allocation2 + $0x8] sm:$0xff] %vm199_vm1, %v519_v35  ;;  %541 = vperm.xlu1 %1290, %v519_v35  }
 0x1cf   : > { %v514_v38 = vpop.xlane.xlu1 %513 }
 0x1d0   : > { %v520_v39 = vmax.f32 %v503_v36, %v514_v38  ;;  %v528_v0 = vmul.f32 1.442695, %v523_v37 }
 0x1d2   : > { %v524_v41 = vsub.f32 %v503_v36, %v520_v39  ;;  %925 = vst.msk [vmem:[#allocation2 + $0x10] sm:$0xff] %vm199_vm1, %v520_v39  ;;  %546 = vperm.xlu1 %1290, %v520_v39  }
 0x1d3   : > { %v517_v42 = vpop.xlane.xlu1 %516 }
 0x1d4   : > { %v521_v43 = vmax.f32 %v504_v40, %v517_v42  ;;  %v530_v4 = vmul.f32 1.442695, %v524_v41 }
 0x1d6   : > { %v525_v44 = vsub.f32 %v504_v40, %v521_v43  ;;  %926 = vst.msk [vmem:[#allocation2 + $0x18] sm:$0xff] %vm199_vm1, %v521_v43  ;;  %551 = vperm.xlu1 %1290, %v521_v43  }
 0x1d8   : > { %v532_v5 = vmul.f32 1.442695, %v525_v44 }
 0x249   : > { %v537_v45 = vpop.permute.xlu0 %536 }
 0x24a   : > { %v554_v46 = vsub.f32 %v287_v16, %v537_v45  ;;  %v568_v16 = vld [vmem:[#allocation3 + $0x10] sm:$0xff] }
 0x24c   : > { %v558_v47 = vmul.f32 1.442695, %v554_v46 }
 0x24d   : > { %v542_v48 = vpop.permute.xlu1 %541 }
 0x24e   : > { %1291 = vpow2.f32 %v558_v47  ;;  %v555_v49 = vsub.f32 %v357_v19, %v542_v48 }
 0x250   : > { %v560_v50 = vmul.f32 1.442695, %v555_v49 }
 0x251   : > { %v547_v51 = vpop.permute.xlu1 %546 }
 0x252   : > { %1293 = vpow2.f32 %v560_v50  ;;  %v556_v52 = vsub.f32 %v427_v22, %v547_v51 }
 0x254   : > { %v562_v53 = vmul.f32 1.442695, %v556_v52 }
 0x255   : > { %v552_v54 = vpop.permute.xlu1 %551 }
 0x256   : > { %1295 = vpow2.f32 %v562_v53  ;;  %v557_v55 = vsub.f32 %v497_v25, %v552_v54 }
 0x258   : > { %v1292_v56 = vpop.eup %1291  ;;  %v564_v57 = vmul.f32 1.442695, %v557_v55 }
 0x259   : > { %1160 = vmatmul.mubr.msk.f32.vlgmr.msra.gmra.mrb[4].mxu0 %vm505_vm2, %v1292_v56  ;;  %v574_v58 = vsel %vm505_vm2, %v1292_v56, 0.0 }
 0x25a   : > { %1297 = vpow2.f32 %v564_v57  ;;  %575 = vadd.xlane.f32.xlu1 %v574_v58  ;;  %1203 = vmatpush3.bf16.msra.mxu0 %v1658_v13 }
 0x25b   : > { %1173 = vmatprep.mubr.msk.f32.mxu0 %vm1466_vm0, %v1467_v1  ;;  %1299 = vpow2.f32 %v528_v0 }
 0x25c   : > { %v1294_v59 = vpop.eup %1293  ;;  %1301 = vpow2.f32 %v526_v3 }
 0x25d   : > { %1167 = vmatmul.mubr.msk.f32.vlgmr.msra.gmra.mrb[4].mxu1 %vm505_vm2, %v1294_v59  ;;  %v577_v60 = vsel %vm505_vm2, %v1294_v59, 0.0  ;;  %1303 = vpow2.f32 %v530_v4 }
 0x25e   : > { %578 = vadd.xlane.f32.xlu0 %v577_v60  ;;  %1206 = vmatpush3.bf16.msra.mxu1 %v1660_v14  ;;  %1305 = vpow2.f32 %v532_v5 }
 0x25f   : > { %1180 = vmatprep.mubr.msk.f32.mxu1 %vm1466_vm0, %v1467_v1 }
 0x260   : > { %v1296_v61 = vpop.eup %1295 }
 0x261   : > { %1174 = vmatmul.mubr.msk.f32.vlgmr.msra.gmra.mrb[6].mxu0 %vm505_vm2, %v1296_v61  ;;  %v580_v62 = vsel %vm505_vm2, %v1296_v61, 0.0 }
 0x262   : > { %581 = vadd.xlane.f32.xlu1 %v580_v62 }
 0x264   : > { %v1298_v63 = vpop.eup %1297 }
 0x265   : > { %1181 = vmatmul.mubr.msk.f32.vlgmr.msra.gmra.mrb[6].mxu1 %vm505_vm2, %v1298_v63  ;;  %v583_v2 = vsel %vm505_vm2, %v1298_v63, 0.0  ;;  %v1300_v1 = vpop.eup %1299 }
 0x266   : > { %584 = vadd.xlane.f32.xlu1 %v583_v2  ;;  %v1302_v6 = vpop.eup %1301  ;;  %v571_v14 = vmul.f32 %v1300_v1, %v567_v12 }
 0x267   : > { %v1304_v7 = vpop.eup %1303  ;;  %v570_v10 = vmul.f32 %v1302_v6, %v566_v9 }
 0x268   : > { %v1306_v8 = vpop.eup %1305  ;;  %v572_v18 = vmul.f32 %v1304_v7, %v568_v16 }
 0x269   : > { %v573_v23 = vmul.f32 %v1306_v8, %v569_v20 }
 0x274   : > { %606 = vperm.xlu0 %1289, %v1300_v1  }
 0x277   : > { %601 = vperm.xlu1 %1290, %v1302_v6  }
 0x27b   : > { %611 = vperm.xlu1 %1290, %v1304_v7  }
 0x27f   : > { %616 = vperm.xlu1 %1290, %v1306_v8  }
 0x2e7   : > { %v576_v11 = vpop.xlane.xlu1 %575 }
 0x2e8   : > { %v586_v13 = vadd.f32 %v576_v11, %v570_v10 }
 0x2ea   : > { %591 = vst.msk [vmem:[#allocation3] sm:$0xff] %vm199_vm1, %v586_v13 }
 0x2eb   : > { %v579_v15 = vpop.xlane.xlu0 %578 }
 0x2ec   : > { %v587_v17 = vadd.f32 %v579_v15, %v571_v14 }
 0x2ee   : > { %592 = vst.msk [vmem:[#allocation3 + $0x8] sm:$0xff] %vm199_vm1, %v587_v17 }
 0x2ef   : > { %v582_v19 = vpop.xlane.xlu1 %581 }
 0x2f0   : > { %v588_v21 = vadd.f32 %v582_v19, %v572_v18 }
 0x2f1   : > { %v930_v22 = vld [vmem:[#allocation3] sm:$0xff] }
 0x2f2   : > { %593 = vst.msk [vmem:[#allocation3 + $0x10] sm:$0xff] %vm199_vm1, %v588_v21  ;;  %1307 = vrcp.f32 %v930_v22 }
 0x2f3   : > { %v585_v24 = vpop.xlane.xlu1 %584  ;;  %v607_v45 = vpop.permute.xlu0 %606 }
 0x2f4   : > { %v589_v25 = vadd.f32 %v585_v24, %v573_v23  ;;  %v620_v48 = vmul.f32 0.0, %v607_v45 }
 0x2f5   : > { %v931_v26 = vld [vmem:[#allocation3 + $0x8] sm:$0xff] }
 0x2f6   : > { %594 = vst.msk [vmem:[#allocation3 + $0x18] sm:$0xff] %vm199_vm1, %v589_v25  ;;  %1309 = vrcp.f32 %v931_v26 }
 0x2f7   : > { %v602_v41 = vpop.permute.xlu1 %601 }
 0x2f8   : > { %v619_v44 = vmul.f32 0.0, %v602_v41 }
 0x2f9   : > { %v932_v27 = vld [vmem:[#allocation3 + $0x10] sm:$0xff] }
 0x2fa   : > { %1311 = vrcp.f32 %v932_v27 }
 0x2fb   : > { %v612_v42 = vpop.permute.xlu1 %611 }
 0x2fc   : > { %v1308_v28 = vpop.eup %1307  ;;  %v621_v52 = vmul.f32 0.0, %v612_v42 }
 0x2fd   : > { %944 = vperm.xlu1 %1290, %v1308_v28   ;;  %v933_v29 = vld [vmem:[#allocation3 + $0x18] sm:$0xff] }
 0x2fe   : > { %1313 = vrcp.f32 %v933_v29 }
 0x2ff   : > { %v617_v43 = vpop.permute.xlu1 %616 }
 0x300   : > { %v1310_v30 = vpop.eup %1309  ;;  %v622_v56 = vmul.f32 0.0, %v617_v43 }
 0x301   : > { %949 = vperm.xlu0 %1289, %v1310_v30  }
 0x304   : > { %v1312_v31 = vpop.eup %1311 }
 0x305   : > { %954 = vperm.xlu1 %1290, %v1312_v31  }
 0x308   : > { %v1314_v32 = vpop.eup %1313 }
 0x309   : > { %959 = vperm.xlu0 %1289, %v1314_v32  }
 0x32c   : > { %v692_v33 = vpop.f32.mrb[4].mxu0 }
 0x32d   : > { %v1161_v34 = vpop.f32.mrb[5].mxu0  ;;  %v915_v46 = vadd.f32 %v692_v33, %v619_v44 }
 0x330   : > { %v765_v35 = vpop.f32.mrb[4].mxu1 }
 0x331   : > { %v1168_v36 = vpop.f32.mrb[5].mxu1  ;;  %v916_v50 = vadd.f32 %v765_v35, %v620_v48 }
 0x334   : > { %v838_v37 = vpop.f32.mrb[6].mxu0 }
 0x335   : > { %v1175_v38 = vpop.f32.mrb[7].mxu0  ;;  %v917_v54 = vadd.f32 %v838_v37, %v621_v52 }
 0x338   : > { %v911_v39 = vpop.f32.mrb[6].mxu1 }
 0x339   : > { %v1182_v40 = vpop.f32.mrb[7].mxu1  ;;  %v918_v58 = vadd.f32 %v911_v39, %v622_v56 }
 0x37c   : > { %v945_v47 = vpop.permute.xlu1 %944 }
 0x37d   : > { %v962_v49 = vmul.f32 %v945_v47, %v915_v46 }
 0x37f   : > { %966 = vst [vmem:[%s191_s20] sm:$0xff] %v962_v49 }
 0x380   : > { %v950_v51 = vpop.permute.xlu0 %949 }
 0x381   : > { %v963_v53 = vmul.f32 %v950_v51, %v916_v50 }
 0x383   : > { %967 = vst [vmem:[%s191_s20 + $0x8] sm:$0xff] %v963_v53 }
 0x384   : > { %v955_v55 = vpop.permute.xlu1 %954 }
 0x385   : > { %v964_v57 = vmul.f32 %v955_v55, %v917_v54 }
 0x387   : > { %968 = vst [vmem:[%s191_s20 + $0x10] sm:$0xff] %v964_v57 }
 0x388   : > { %v960_v59 = vpop.permute.xlu0 %959 }
 0x389   : > { %v965_v60 = vmul.f32 %v960_v59, %v918_v58 }
 0x38b   : > { %969 = vst [vmem:[%s191_s20 + $0x18] sm:$0xff] %v965_v60 }
 0x38c   : > { %1386 = shalt.err (!%p1383_p7)
}
 0x38d   : > { %s1387_s6 = scalar_lea.hbm %s1717_s29, 512  ;;  %s1391_s24 = scalar_lea.hbm %s1768_s2, 1024 }
 0x38e   : > { %p1388_p13 = scmp.ne.s32.totalorder %s1717_s29, %s1387_s6  ;;  %p1392_p12 = scmp.lt.u32.totalorder %s1717_s29, %s1768_s2 }
 0x38f   : > { %p1393_p4 = scmp.lt.u32.totalorder %s1391_s24, %s1387_s6  ;;  %p1395_p8 = scmp.lt.u32.totalorder %s1387_s6, %s1717_s29 }
 0x390   : > { %p1389_p2 = pnand %p1388_p13, %p1789_p10 }
 0x391   : > { %p1394_p5 = por %p1393_p4, %p1392_p12 }
 0x392   : > { %p1390_p6 = pneg %p1389_p2 }
 0x393   : > { %p1396_p11 = por %p1395_p8, %p1394_p5 }
 0x395   : > { %p1397_p1 = pnand %p1396_p11, %p1390_p6 }
 0x397   : > { %1400 = shalt.err (!%p1397_p1)
}
 0x398   : > { %s1471_s18 = smov 128   ;;  %s1472_s20 = smov 8  }
 0x399   : > { %1213 = dma.vmem_to_hbm [thread:$0]  (%p1789_p10), %s1712_s23, 512, %s1717_s29, %s971_s5, %s1471_s18, %s1471_s18, %s1472_s20  }
 0x39a PF: > { %s999_s26 = sand.u32 1, %s1439_s9   ;;  %p1790_p0 = scmp.ne.s32.totalorder %s1779_s22, 0 }
 0x39b   : > { %p1791_p9 = scmp.ge.s32.totalorder %s1459_s14, 2  ;;  %s1000_s7 = scalar_lea.sflag [#allocation7], %s999_s26 }
 0x39d   : > { %p1224_p3 = pnand %p1791_p9, %p1790_p0 }
 0x39f   : > { %1434 = dma.done.wait (!%p1224_p3), %s1000_s7, 512  }
 0x3a0   : > { %1436 = vsyncadd (!%p1224_p3), %s1000_s7, 4294966784  ;;  %s19_s14 = sadd.s32 1, %s1459_s14   ;;  %s1792_s9 = smov %s1443_s10 }
 0x3a1   : > { %p16_p7 = scmp.ge.s32.totalorder %s19_s14, 4   ;;  %s1793_s10 = smov %s1447_s11 }
 0x3a2   : > { %s1794_s11 = smov %s1607_s25  ;;  %s1795_s12 = smov %s1455_s13 }
 0x3a3   : > { %s1796_s13 = smov %s1798_s28  ;;  %18 = sbr.rel (!%p16_p7) target bundleno = 7 (0x7), region = 85 }
 0x3aa   :  { %1005 = vsyncpa [#allocation6], 1 }
 0x3ab   :  { %1007 = vsyncpa [#allocation6 + $0x1], 1 }
 0x3ac   :  { %1008 = vsyncpa [#allocation9], 1 }
 0x3ad   :  { %1009 = vsyncpa [#allocation7], 1 }
 0x3ae   :  { %1011 = vsyncpa [#allocation7 + $0x1], 1 }

</bundles_post_ra>
